<compile_context>
chip_gen: v7x
topology: tpu7x:2x2x1
jax: 0.10.0
libtpu: 0.0.40
codegen_flags: <defaults>
</compile_context>

<pallas_src>
import jax
import jax.numpy as jnp
from jax.experimental import pallas as pl
from jax.experimental.pallas import tpu as pltpu


def _ceil128(n):
    return ((n + 127) // 128) * 128


# ----------------------------------------------------------------------------
# Fused Pallas kernel
# ----------------------------------------------------------------------------
def _fused_student_kernel(
    x_ref,        # (B, D)   flattened input
    eps_ref,      # (B, L)   standard-normal noise (drawn in the wrapper)
    ew1_ref,      # (D, H)   encoder layer 1
    ew2_ref,      # (H, 2L)  encoder stats head [mu | logvar] (single matmul)
    dw1_ref,      # (L, H)   decoder layer 1
    dw2_ref,      # (H, D)   decoder layer 2
    bias_ref,     # (1, ceil128(H)+ceil128(2L)+ceil128(H)+D)  packed biases
    logits_ref,   # (B, D)   output: reconstruction logits
    xact_ref,     # (B, D)   output: sigmoid(logits)
    small_ref,    # (B, 5L)  output: [mu | logvar | z | mu_hat | logvar_hat]
):
    D, H = ew1_ref.shape
    _, L2 = ew2_ref.shape
    L = L2 // 2

    # 128-lane-aligned offsets into the packed bias slab (static ref slices).
    o1 = _ceil128(H)
    o2 = o1 + _ceil128(L2)
    o3 = o2 + _ceil128(H)
    eb1 = bias_ref[:, 0:H]
    eb2 = bias_ref[:, o1:o1 + L2]
    db1 = bias_ref[:, o2:o2 + H]
    db2 = bias_ref[:, o3:o3 + D]

    # Encoder weights hoisted once; reused for the re-posterior pass.
    ew1 = ew1_ref[...]
    ew2 = ew2_ref[...]

    def encode(v):
        h = jnp.tanh(jnp.dot(v, ew1, preferred_element_type=jnp.float32) + eb1)
        return jnp.dot(h, ew2, preferred_element_type=jnp.float32) + eb2  # (B, 2L)

    # ---- student.posterior(x) ----------------------------------------------
    x = x_ref[...]
    stats = encode(x)                      # single matmul for [mu | logvar]
    mu = stats[:, 0:L]
    logvar = stats[:, L:L2]

    # Gaussian reparameterization with externally supplied eps ~ N(0, 1).
    z = mu + jnp.exp(0.5 * logvar) * eps_ref[...]

    # ---- student.decode(z) ---------------------------------------------------
    hd = jnp.tanh(jnp.dot(z, dw1_ref[...], preferred_element_type=jnp.float32)
                  + db1)
    logits = (jnp.dot(hd, dw2_ref[...], preferred_element_type=jnp.float32)
              + db2)

    # ---- nll_activation (bernoulli -> sigmoid) -------------------------------
    x_act = jax.nn.sigmoid(logits)

    # ---- student.posterior(x_act): q(z | x_hat) ------------------------------
    stats_hat = encode(x_act)

    # Lane-dense outputs: two full-width (B, D) slabs + one packed (B, 5L).
    logits_ref[...] = logits
    xact_ref[...] = x_act
    small_ref[:, 0:L2] = stats
    small_ref[:, L2:L2 + L] = z
    small_ref[:, L2 + L:L2 + L + L2] = stats_hat


def fused_student_forward(params, x_flat, eps):
    """One pallas_call covering the full student forward + re-posterior."""
    B, D = x_flat.shape
    L = params["dec_w1"].shape[0]

    def pad128(b):
        pad = (-b.shape[-1]) % 128
        return jnp.pad(b, ((0, 0), (0, pad))) if pad else b

    # Pack the four bias rows into a single 128-lane-aligned slab (one DMA).
    bias = jnp.concatenate(
        [pad128(params["enc_b1"]), pad128(params["enc_b2"]),
         pad128(params["dec_b1"]), params["dec_b2"]], axis=-1)

    vmem = pl.BlockSpec(memory_space=pltpu.MemorySpace.VMEM)

    out_shape = (
        jax.ShapeDtypeStruct((B, D), jnp.float32),      # logits
        jax.ShapeDtypeStruct((B, D), jnp.float32),      # sigmoid(logits)
        jax.ShapeDtypeStruct((B, 5 * L), jnp.float32),  # packed small stats
    )

    return pl.pallas_call(
        _fused_student_kernel,
        out_shape=out_shape,
        in_specs=[vmem] * 7,
        out_specs=(vmem, vmem, vmem),
    )(
        x_flat, eps,
        params["enc_w1"], params["enc_w2"],
        params["dec_w1"], params["dec_w2"],
        bias,
    )


# ----------------------------------------------------------------------------
# Synthetic student VAE parameters (ParallellyReparameterizedVAE-like)
# ----------------------------------------------------------------------------
def init_student_params(key, d_in, hidden, latent):
    ks = jax.random.split(key, 4)

    def dense(k, fan_in, fan_out):
        scale = 1.0 / jnp.sqrt(jnp.float32(fan_in))
        w = jax.random.uniform(k, (fan_in, fan_out), jnp.float32, -scale, scale)
        b = jnp.zeros((1, fan_out), jnp.float32)
        return w, b

    ew1, eb1 = dense(ks[0], d_in, hidden)
    ew2, eb2 = dense(ks[1], hidden, 2 * latent)   # -> [mu | logvar]
    dw1, db1 = dense(ks[2], latent, hidden)
    dw2, db2 = dense(ks[3], hidden, d_in)
    return dict(enc_w1=ew1, enc_b1=eb1, enc_w2=ew2, enc_b2=eb2,
                dec_w1=dw1, dec_b1=db1, dec_w2=dw2, dec_b2=db2)


# ----------------------------------------------------------------------------
# StudentTeacher.forward (ratio == 1.0, teacher is None, eval mode)
# ----------------------------------------------------------------------------
@jax.jit
def student_teacher_forward(params, x, rng_key):
    # _augment_data: ratio == 1.0 (or not training) -> identity.
    x_augmented = x
    num_student_samples = None   # never set on this path (matches PyTorch init)
    num_teacher_samples = None

    B = x.shape[0]
    L = params["dec_w1"].shape[0]
    x_flat = x_augmented.reshape(B, -1)

    # Fresh eps ~ N(0,1) each call (torch.randn_like equivalent).
    eps = jax.random.normal(rng_key, (B, L), dtype=jnp.float32)

    logits_flat, x_act_flat, small = fused_student_forward(params, x_flat, eps)

    # Free XLA slices of the packed (B, 5L) slab.
    mu, logvar = small[:, 0:L], small[:, L:2 * L]
    z = small[:, 2 * L:3 * L]
    mu_hat, logvar_hat = small[:, 3 * L:4 * L], small[:, 4 * L:5 * L]

    params_student = {
        "gaussian": {"mu": mu, "logvar": logvar},
        "z": z,
        "q_z_given_xhat": {"gaussian": {"mu": mu_hat, "logvar": logvar_hat}},
    }

    x_recon_logits = logits_flat.reshape(x.shape)
    x_recon_act = x_act_flat.reshape(x.shape)     # reused: no duplicate sigmoid

    ret_map = {
        "student": {
            "params": params_student,
            "x_reconstr": x_recon_act,
            "x_reconstr_logits": x_recon_logits,
        },
        "augmented": {
            "data": x_augmented,
            "num_student": num_student_samples,
            "num_teacher": num_teacher_samples,
        },
    }
    # TODO(synk): teacher branch (self.teacher is None until fork()); the
    # posterior/likelihood KL regularizers live in loss_function, not forward.
    return ret_map


# ----------------------------------------------------------------------------
# Driver
# ----------------------------------------------------------------------------
if __name__ == "__main__":
    B, C, H, W = 2, 4, 16, 16
    HIDDEN, LATENT = 32, 16
    D_IN = C * H * W

    key = jax.random.PRNGKey(0)
    k_param, k_data, k_eps = jax.random.split(key, 3)

    params = init_student_params(k_param, D_IN, HIDDEN, LATENT)
    x = jax.random.normal(k_data, (B, C, H, W), dtype=jnp.float32)

    ret_map = student_teacher_forward(params, x, k_eps)
    jax.block_until_ready(ret_map)

    # Sanity checks on shapes / finiteness
    assert ret_map["student"]["x_reconstr_logits"].shape == (B, C, H, W)
    assert ret_map["student"]["x_reconstr"].shape == (B, C, H, W)
    assert ret_map["student"]["params"]["gaussian"]["mu"].shape == (B, LATENT)
    assert ret_map["student"]["params"]["gaussian"]["logvar"].shape == (B, LATENT)
    assert ret_map["student"]["params"]["z"].shape == (B, LATENT)
    assert (ret_map["student"]["params"]["q_z_given_xhat"]["gaussian"]["mu"].shape
            == (B, LATENT))
    assert bool(jnp.all(jnp.isfinite(ret_map["student"]["x_reconstr"])))
    assert bool(jnp.all(jnp.isfinite(ret_map["student"]["params"]["z"])))
    assert bool(jnp.all(
        ret_map["student"]["x_reconstr"] >= 0.0)) and bool(jnp.all(
        ret_map["student"]["x_reconstr"] <= 1.0))

    print("KERNEL_OK")
</pallas_src>

<mosaic_0001>
module attributes {stable_mosaic.version = 11 : i64} {
  func.func @_fused_student_kernel(%arg0: memref<2x1024xf32, #tpu.memory_space<vmem>>, %arg1: memref<2x16xf32, #tpu.memory_space<vmem>>, %arg2: memref<1024x32xf32, #tpu.memory_space<vmem>>, %arg3: memref<32x32xf32, #tpu.memory_space<vmem>>, %arg4: memref<16x32xf32, #tpu.memory_space<vmem>>, %arg5: memref<32x1024xf32, #tpu.memory_space<vmem>>, %arg6: memref<1x1408xf32, #tpu.memory_space<vmem>>, %arg7: memref<2x1024xf32, #tpu.memory_space<vmem>>, %arg8: memref<2x1024xf32, #tpu.memory_space<vmem>>, %arg9: memref<2x80xf32, #tpu.memory_space<vmem>>) attributes {dimension_semantics = [], scalar_prefetch = 0 : i64, scratch_operands = 0 : i64, tpu.core_type = #tpu.core_type<tc>} {
    %c0 = arith.constant 0 : index
    %c0_0 = arith.constant 0 : index
    %0 = vector.load %arg6[%c0, %c0_0] : memref<1x1408xf32, #tpu.memory_space<vmem>>, vector<1x32xf32>
    %c0_1 = arith.constant 0 : index
    %c128 = arith.constant 128 : index
    %1 = vector.load %arg6[%c0_1, %c128] : memref<1x1408xf32, #tpu.memory_space<vmem>>, vector<1x32xf32>
    %c0_2 = arith.constant 0 : index
    %c256 = arith.constant 256 : index
    %2 = vector.load %arg6[%c0_2, %c256] : memref<1x1408xf32, #tpu.memory_space<vmem>>, vector<1x32xf32>
    %c0_3 = arith.constant 0 : index
    %c384 = arith.constant 384 : index
    %3 = vector.load %arg6[%c0_3, %c384] : memref<1x1408xf32, #tpu.memory_space<vmem>>, vector<1x1024xf32>
    %c0_4 = arith.constant 0 : index
    %c0_5 = arith.constant 0 : index
    %4 = vector.load %arg2[%c0_4, %c0_5] : memref<1024x32xf32, #tpu.memory_space<vmem>>, vector<1024x32xf32>
    %c0_6 = arith.constant 0 : index
    %c0_7 = arith.constant 0 : index
    %5 = vector.load %arg3[%c0_6, %c0_7] : memref<32x32xf32, #tpu.memory_space<vmem>>, vector<32x32xf32>
    %c0_8 = arith.constant 0 : index
    %c0_9 = arith.constant 0 : index
    %6 = vector.load %arg0[%c0_8, %c0_9] : memref<2x1024xf32, #tpu.memory_space<vmem>>, vector<2x1024xf32>
    %cst = arith.constant dense<0.000000e+00> : vector<2x32xf32>
    %7 = tpu.matmul %6, %4, %cst {dimension_numbers = #tpu.dot_dimension_numbers<[1], [0], [0], [1], [0, 0, 1, 1], [], []>} : vector<2x1024xf32>, vector<1024x32xf32>, vector<2x32xf32> -> vector<2x32xf32>
    %8 = vector.broadcast %0 : vector<1x32xf32> to vector<2x32xf32>
    %9 = arith.addf %7, %8 : vector<2x32xf32>
    %10 = math.tanh %9 : vector<2x32xf32>
    %cst_10 = arith.constant dense<0.000000e+00> : vector<2x32xf32>
    %11 = tpu.matmul %10, %5, %cst_10 {dimension_numbers = #tpu.dot_dimension_numbers<[1], [0], [0], [1], [0, 0, 1, 1], [], []>} : vector<2x32xf32>, vector<32x32xf32>, vector<2x32xf32> -> vector<2x32xf32>
    %12 = vector.broadcast %1 : vector<1x32xf32> to vector<2x32xf32>
    %13 = arith.addf %11, %12 : vector<2x32xf32>
    %14 = vector.extract_strided_slice %13 {offsets = [0, 0], sizes = [2, 16], strides = [1, 1]} : vector<2x32xf32> to vector<2x16xf32>
    %15 = vector.extract_strided_slice %13 {offsets = [0, 16], sizes = [2, 16], strides = [1, 1]} : vector<2x32xf32> to vector<2x16xf32>
    %cst_11 = arith.constant 5.000000e-01 : f32
    %16 = vector.broadcast %cst_11 : f32 to vector<2x16xf32>
    %17 = arith.mulf %16, %15 : vector<2x16xf32>
    %18 = math.exp %17 : vector<2x16xf32>
    %c0_12 = arith.constant 0 : index
    %c0_13 = arith.constant 0 : index
    %19 = vector.load %arg1[%c0_12, %c0_13] : memref<2x16xf32, #tpu.memory_space<vmem>>, vector<2x16xf32>
    %20 = arith.mulf %18, %19 : vector<2x16xf32>
    %21 = arith.addf %14, %20 : vector<2x16xf32>
    %c0_14 = arith.constant 0 : index
    %c0_15 = arith.constant 0 : index
    %22 = vector.load %arg4[%c0_14, %c0_15] : memref<16x32xf32, #tpu.memory_space<vmem>>, vector<16x32xf32>
    %cst_16 = arith.constant dense<0.000000e+00> : vector<2x32xf32>
    %23 = tpu.matmul %21, %22, %cst_16 {dimension_numbers = #tpu.dot_dimension_numbers<[1], [0], [0], [1], [0, 0, 1, 1], [], []>} : vector<2x16xf32>, vector<16x32xf32>, vector<2x32xf32> -> vector<2x32xf32>
    %24 = vector.broadcast %2 : vector<1x32xf32> to vector<2x32xf32>
    %25 = arith.addf %23, %24 : vector<2x32xf32>
    %26 = math.tanh %25 : vector<2x32xf32>
    %c0_17 = arith.constant 0 : index
    %c0_18 = arith.constant 0 : index
    %27 = vector.load %arg5[%c0_17, %c0_18] : memref<32x1024xf32, #tpu.memory_space<vmem>>, vector<32x1024xf32>
    %cst_19 = arith.constant dense<0.000000e+00> : vector<2x1024xf32>
    %28 = tpu.matmul %26, %27, %cst_19 {dimension_numbers = #tpu.dot_dimension_numbers<[1], [0], [0], [1], [0, 0, 1, 1], [], []>} : vector<2x32xf32>, vector<32x1024xf32>, vector<2x1024xf32> -> vector<2x1024xf32>
    %29 = vector.broadcast %3 : vector<1x1024xf32> to vector<2x1024xf32>
    %30 = arith.addf %28, %29 : vector<2x1024xf32>
    %31 = arith.negf %30 : vector<2x1024xf32>
    %32 = math.exp %31 : vector<2x1024xf32>
    %cst_20 = arith.constant 1.000000e+00 : f32
    %33 = vector.broadcast %cst_20 : f32 to vector<2x1024xf32>
    %34 = arith.addf %33, %32 : vector<2x1024xf32>
    %35 = arith.divf %33, %34 : vector<2x1024xf32>
    %cst_21 = arith.constant dense<0.000000e+00> : vector<2x32xf32>
    %36 = tpu.matmul %35, %4, %cst_21 {dimension_numbers = #tpu.dot_dimension_numbers<[1], [0], [0], [1], [0, 0, 1, 1], [], []>} : vector<2x1024xf32>, vector<1024x32xf32>, vector<2x32xf32> -> vector<2x32xf32>
    %37 = vector.broadcast %0 : vector<1x32xf32> to vector<2x32xf32>
    %38 = arith.addf %36, %37 : vector<2x32xf32>
    %39 = math.tanh %38 : vector<2x32xf32>
    %cst_22 = arith.constant dense<0.000000e+00> : vector<2x32xf32>
    %40 = tpu.matmul %39, %5, %cst_22 {dimension_numbers = #tpu.dot_dimension_numbers<[1], [0], [0], [1], [0, 0, 1, 1], [], []>} : vector<2x32xf32>, vector<32x32xf32>, vector<2x32xf32> -> vector<2x32xf32>
    %41 = vector.broadcast %1 : vector<1x32xf32> to vector<2x32xf32>
    %42 = arith.addf %40, %41 : vector<2x32xf32>
    %c0_23 = arith.constant 0 : index
    %c0_24 = arith.constant 0 : index
    %43 = vector.load %arg7[%c0_23, %c0_24] : memref<2x1024xf32, #tpu.memory_space<vmem>>, vector<2x1024xf32>
    tpu.vector_store %arg7[%c0_23, %c0_24], %30 {strides = array<i32>} : memref<2x1024xf32, #tpu.memory_space<vmem>>, vector<2x1024xf32>,
    %c0_25 = arith.constant 0 : index
    %c0_26 = arith.constant 0 : index
    %44 = vector.load %arg8[%c0_25, %c0_26] : memref<2x1024xf32, #tpu.memory_space<vmem>>, vector<2x1024xf32>
    tpu.vector_store %arg8[%c0_25, %c0_26], %35 {strides = array<i32>} : memref<2x1024xf32, #tpu.memory_space<vmem>>, vector<2x1024xf32>,
    %c0_27 = arith.constant 0 : index
    %c0_28 = arith.constant 0 : index
    %45 = vector.load %arg9[%c0_27, %c0_28] : memref<2x80xf32, #tpu.memory_space<vmem>>, vector<2x32xf32>
    tpu.vector_store %arg9[%c0_27, %c0_28], %13 {strides = array<i32>} : memref<2x80xf32, #tpu.memory_space<vmem>>, vector<2x32xf32>,
    %c0_29 = arith.constant 0 : index
    %c32 = arith.constant 32 : index
    %46 = vector.load %arg9[%c0_29, %c32] : memref<2x80xf32, #tpu.memory_space<vmem>>, vector<2x16xf32>
    tpu.vector_store %arg9[%c0_29, %c32], %21 {strides = array<i32>} : memref<2x80xf32, #tpu.memory_space<vmem>>, vector<2x16xf32>,
    %c0_30 = arith.constant 0 : index
    %c48 = arith.constant 48 : index
    %47 = vector.load %arg9[%c0_30, %c48] : memref<2x80xf32, #tpu.memory_space<vmem>>, vector<2x32xf32>
    tpu.vector_store %arg9[%c0_30, %c48], %42 {strides = array<i32>} : memref<2x80xf32, #tpu.memory_space<vmem>>, vector<2x32xf32>,
    return
  }
}

</mosaic_0001>

<bundles_post_ra>
// kernel: student_teacher_forward.1
= control target key start
LH: loop header
LB: loop body
LE: loop exit
PB: predicated region body
PF: predicated region fallthrough
CT: control target
= control target key end

     0   :  { %v2247_v47 = vmov 1983009808   ;;  %v179_v49 = vlaneseq  ;;  %vm2249_vm0 = vmmov 0   ;;  %s2251_s19 = smov 16   ;;  %vm504_vm1 = vcmask 261120   ;;  %s2253_s28 = smov 32   ;;  %s3173_s2 = inlined_call_operand.vmem [shape: f32[1024,32], index: 2, kind: input, shape index: {}]   ;;  %s3174_s0 = inlined_call_operand.vmem [shape: f32[2,1024], index: 0, kind: input, shape index: {}]   ;;  %s3175_s3 = inlined_call_operand.vmem [shape: f32[32,32], index: 3, kind: input, shape index: {}]   ;;  %s3176_s1 = inlined_call_operand.vmem [shape: f32[2,16], index: 1, kind: input, shape index: {}]   ;;  %s3177_s6 = inlined_call_operand.vmem [shape: f32[1,1408], index: 6, kind: input, shape index: {}]   ;;  %s3178_s4 = inlined_call_operand.vmem [shape: f32[16,32], index: 4, kind: input, shape index: {}]   ;;  %s3179_s9 = inlined_call_operand.vmem [shape: f32[2,80], index: 9, kind: output, shape index: {2}]   ;;  %s3180_s5 = inlined_call_operand.vmem [shape: f32[32,1024], index: 5, kind: input, shape index: {}]   ;;  %s3181_s7 = inlined_call_operand.vmem [shape: f32[2,1024], index: 7, kind: output, shape index: {0}]   ;;  %s3182_s8 = inlined_call_operand.vmem [shape: f32[2,1024], index: 8, kind: output, shape index: {1}]  }
   0x1   :  { %v49_v0 = vld [vmem:[%s3173_s2 + $0x80] sm:$0xff]  ;;  %v50_v1 = vld [vmem:[%s3173_s2 + $0x88] sm:$0xff]  ;;  %v51_v11 = vld [vmem:[%s3173_s2 + $0x90] sm:$0xff]  ;;  %v177_v48 = vunpack.c.l.s4 %v2247_v47  ;;  %vm1529_vm2 = vcmask 254976   ;;  %vm600_vm3 = vcmask 130048   ;;  %vm1534_vm4 = vcmask 386304  }
   0x2   :  { %v33_v2 = vld [vmem:[%s3173_s2] sm:$0xff]  ;;  %v2314_v3 = vpack.c.bf16 %v50_v1, %v49_v0  ;;  %v34_v4 = vld [vmem:[%s3173_s2 + $0x8] sm:$0xff]  ;;  %v52_v13 = vld [vmem:[%s3173_s2 + $0x98] sm:$0xff]  ;;  %v2481_v0 = vshrl.u32 %v179_v49, 7  ;;  %vm1540_vm5 = vcmask 648576  }
   0x3   :  { %v81_v5 = vld [vmem:[%s3173_s2 + $0x180] sm:$0xff]  ;;  %v82_v6 = vld [vmem:[%s3173_s2 + $0x188] sm:$0xff]  ;;  %v2325_v7 = vpack.c.bf16 %v34_v4, %v33_v2  ;;  %v35_v14 = vld [vmem:[%s3173_s2 + $0x10] sm:$0xff]  ;;  %v2352_v16 = vpack.c.bf16 %v52_v13, %v51_v11  ;;  %v178_v63 = vunpack.c.0.s8 %v177_v48 }
   0x4   :  { %v2327_v8 = vpack.c.bf16 %v82_v6, %v81_v5  ;;  %v65_v9 = vld [vmem:[%s3173_s2 + $0x100] sm:$0xff]  ;;  %v66_v10 = vld [vmem:[%s3173_s2 + $0x108] sm:$0xff]  ;;  %1895 = vmatprep.subr.bf16.mxu0 %v2314_v3  ;;  %v36_v15 = vld [vmem:[%s3173_s2 + $0x18] sm:$0xff] }
   0x5   :  { %v2339_v12 = vpack.c.bf16 %v66_v10, %v65_v9  ;;  %1897 = vmatpush3.bf16.msra.mxu0 %v2325_v7  ;;  %v2354_v17 = vpack.c.bf16 %v36_v15, %v35_v14  ;;  %v83_v18 = vld [vmem:[%s3173_s2 + $0x190] sm:$0xff]  ;;  %v84_v19 = vld [vmem:[%s3173_s2 + $0x198] sm:$0xff]  ;;  %v53_v23 = vld [vmem:[%s3173_s2 + $0xa0] sm:$0xff] }
   0x6   :  { %1927 = vmatprep.subr.bf16.mxu1 %v2327_v8  ;;  %v67_v20 = vld [vmem:[%s3173_s2 + $0x110] sm:$0xff]  ;;  %v2366_v21 = vpack.c.bf16 %v84_v19, %v83_v18  ;;  %v68_v22 = vld [vmem:[%s3173_s2 + $0x118] sm:$0xff]  ;;  %v54_v24 = vld [vmem:[%s3173_s2 + $0xa8] sm:$0xff]  ;;  %1899 = vmatprep.subr.bf16.mxu0 %v2352_v16  ;;  %v2520_v19 = vsub.s32 %v178_v63, %v2481_v0 }
   0x7   :  { %1929 = vmatpush3.bf16.msra.mxu1 %v2339_v12  ;;  %v2378_v25 = vpack.c.bf16 %v68_v22, %v67_v20  ;;  %v2380_v26 = vpack.c.bf16 %v54_v24, %v53_v23  ;;  %v37_v27 = vld [vmem:[%s3173_s2 + $0x20] sm:$0xff]  ;;  %v38_v28 = vld [vmem:[%s3173_s2 + $0x28] sm:$0xff]  ;;  %v55_v35 = vld [vmem:[%s3173_s2 + $0xb0] sm:$0xff] }
   0x8   :  { %v85_v29 = vld [vmem:[%s3173_s2 + $0x1a0] sm:$0xff]  ;;  %1931 = vmatprep.subr.bf16.mxu1 %v2366_v21  ;;  %v86_v30 = vld [vmem:[%s3173_s2 + $0x1a8] sm:$0xff]  ;;  %v2402_v33 = vpack.c.bf16 %v38_v28, %v37_v27  ;;  %v56_v36 = vld [vmem:[%s3173_s2 + $0xb8] sm:$0xff] }
   0x9   :  { %v69_v31 = vld [vmem:[%s3173_s2 + $0x120] sm:$0xff]  ;;  %v70_v32 = vld [vmem:[%s3173_s2 + $0x128] sm:$0xff]  ;;  %1901 = vmatpush3.bf16.msra.mxu0 %v2354_v17  ;;  %v2404_v34 = vpack.c.bf16 %v86_v30, %v85_v29  ;;  %v39_v37 = vld [vmem:[%s3173_s2 + $0x30] sm:$0xff]  ;;  %v2419_v39 = vpack.c.bf16 %v56_v36, %v55_v35 }
   0xa   :  { %1903 = vmatprep.subr.bf16.mxu0 %v2380_v26  ;;  %v2417_v38 = vpack.c.bf16 %v70_v32, %v69_v31  ;;  %v40_v40 = vld [vmem:[%s3173_s2 + $0x38] sm:$0xff]  ;;  %v87_v41 = vld [vmem:[%s3173_s2 + $0x1b0] sm:$0xff]  ;;  %v57_v46 = vld [vmem:[%s3173_s2 + $0xc0] sm:$0xff] }
   0xb   :  { %1933 = vmatpush3.bf16.msra.mxu1 %v2378_v25  ;;  %v88_v42 = vld [vmem:[%s3173_s2 + $0x1b8] sm:$0xff]  ;;  %v71_v44 = vld [vmem:[%s3173_s2 + $0x130] sm:$0xff]  ;;  %v58_v50 = vld [vmem:[%s3173_s2 + $0xc8] sm:$0xff]  ;;  %v2446_v51 = vpack.c.bf16 %v40_v40, %v39_v37 }
   0xc   :  { %1935 = vmatprep.subr.bf16.mxu1 %v2404_v34  ;;  %v2431_v43 = vpack.c.bf16 %v88_v42, %v87_v41  ;;  %v72_v45 = vld [vmem:[%s3173_s2 + $0x138] sm:$0xff]  ;;  %v89_v52 = vld [vmem:[%s3173_s2 + $0x1c0] sm:$0xff]  ;;  %v90_v53 = vld [vmem:[%s3173_s2 + $0x1c8] sm:$0xff]  ;;  %v2458_v55 = vpack.c.bf16 %v58_v50, %v57_v46 }
   0xd   :  { %1905 = vmatpush3.bf16.msra.mxu0 %v2402_v33  ;;  %v2456_v54 = vpack.c.bf16 %v72_v45, %v71_v44  ;;  %v41_v56 = vld [vmem:[%s3173_s2 + $0x40] sm:$0xff]  ;;  %v42_v57 = vld [vmem:[%s3173_s2 + $0x48] sm:$0xff]  ;;  %v2470_v59 = vpack.c.bf16 %v90_v53, %v89_v52  ;;  %v59_v61 = vld [vmem:[%s3173_s2 + $0xd0] sm:$0xff] }
   0xe   :  { %1907 = vmatprep.subr.bf16.mxu0 %v2419_v39  ;;  %v73_v58 = vld [vmem:[%s3173_s2 + $0x140] sm:$0xff]  ;;  %v74_v60 = vld [vmem:[%s3173_s2 + $0x148] sm:$0xff]  ;;  %v60_v62 = vld [vmem:[%s3173_s2 + $0xd8] sm:$0xff]  ;;  %v2490_v4 = vpack.c.bf16 %v42_v57, %v41_v56 }
   0xf   :  { %1937 = vmatpush3.bf16.msra.mxu1 %v2417_v38  ;;  %v91_v1 = vld [vmem:[%s3173_s2 + $0x1d0] sm:$0xff]  ;;  %v92_v2 = vld [vmem:[%s3173_s2 + $0x1d8] sm:$0xff]  ;;  %v2494_v5 = vpack.c.bf16 %v74_v60, %v73_v58  ;;  %v2496_v6 = vpack.c.bf16 %v60_v62, %v59_v61  ;;  %v61_v15 = vld [vmem:[%s3173_s2 + $0xe0] sm:$0xff] }
  0x10   :  { %1939 = vmatprep.subr.bf16.mxu1 %v2431_v43  ;;  %v43_v9 = vld [vmem:[%s3173_s2 + $0x50] sm:$0xff]  ;;  %v44_v10 = vld [vmem:[%s3173_s2 + $0x58] sm:$0xff]  ;;  %v2508_v13 = vpack.c.bf16 %v92_v2, %v91_v1  ;;  %v62_v18 = vld [vmem:[%s3173_s2 + $0xe8] sm:$0xff] }
  0x11   :  { %1909 = vmatpush3.bf16.msra.mxu0 %v2446_v51  ;;  %v75_v11 = vld [vmem:[%s3173_s2 + $0x150] sm:$0xff]  ;;  %v76_v14 = vld [vmem:[%s3173_s2 + $0x158] sm:$0xff]  ;;  %v93_v20 = vld [vmem:[%s3173_s2 + $0x1e0] sm:$0xff]  ;;  %v2529_v23 = vpack.c.bf16 %v44_v10, %v43_v9  ;;  %v2538_v28 = vpack.c.bf16 %v62_v18, %v61_v15 }
  0x12   :  { %1911 = vmatprep.subr.bf16.mxu0 %v2458_v55  ;;  %v94_v22 = vld [vmem:[%s3173_s2 + $0x1e8] sm:$0xff]  ;;  %v45_v24 = vld [vmem:[%s3173_s2 + $0x60] sm:$0xff]  ;;  %v2536_v27 = vpack.c.bf16 %v76_v14, %v75_v11  ;;  %v63_v36 = vld [vmem:[%s3173_s2 + $0xf0] sm:$0xff] }
  0x13   :  { %1941 = vmatpush3.bf16.msra.mxu1 %v2456_v54  ;;  %v46_v29 = vld [vmem:[%s3173_s2 + $0x68] sm:$0xff]  ;;  %v77_v30 = vld [vmem:[%s3173_s2 + $0x160] sm:$0xff]  ;;  %v2550_v32 = vpack.c.bf16 %v94_v22, %v93_v20  ;;  %v64_v37 = vld [vmem:[%s3173_s2 + $0xf8] sm:$0xff] }
  0x14   :  { %1943 = vmatprep.subr.bf16.mxu1 %v2470_v59  ;;  %v165_v31 = vld [vmem:[%s3174_s0] sm:$0xff]  ;;  %v78_v35 = vld [vmem:[%s3173_s2 + $0x168] sm:$0xff]  ;;  %v95_v42 = vld [vmem:[%s3173_s2 + $0x1f0] sm:$0xff]  ;;  %v2569_v45 = vpack.c.bf16 %v46_v29, %v45_v24  ;;  %v2579_v50 = vpack.c.bf16 %v64_v37, %v63_v36 }
  0x15   :  { %1913 = vmatpush3.bf16.msra.mxu0 %v2490_v4  ;;  %v182_v40 = vrot.slane %v165_v31, %v2520_v19  ;;  %v175_v41 = vcombine.high %v165_v31, %v165_v31  ;;  %v96_v44 = vld [vmem:[%s3173_s2 + $0x1f8] sm:$0xff]  ;;  %v166_v46 = vld [vmem:[%s3174_s0 + $0x8] sm:$0xff]  ;;  %v2577_v49 = vpack.c.bf16 %v78_v35, %v77_v30  ;;  %v47_v52 = vld [vmem:[%s3173_s2 + $0x70] sm:$0xff] }
  0x16   :  { %1915 = vmatprep.subr.bf16.mxu0 %v2496_v6  ;;  %v48_v53 = vld [vmem:[%s3173_s2 + $0x78] sm:$0xff]  ;;  %v79_v56 = vld [vmem:[%s3173_s2 + $0x170] sm:$0xff]  ;;  %v2591_v57 = vpack.c.bf16 %v96_v44, %v95_v42  ;;  %v113_v60 = vld [vmem:[%s3173_s2 + $0x280] sm:$0xff]  ;;  %v192_v63 = vcombine.high %v166_v46, %v166_v46  ;;  %v2639_v30 = vrot.slane %v166_v46, %v2520_v19 }
  0x17   :  { %1945 = vmatpush3.bf16.msra.mxu1 %v2494_v5  ;;  %v190_v47 = vcombine.high %v182_v40, %v182_v40  ;;  %v189_v48 = vrot.slane %v175_v41, %v2520_v19  ;;  %v80_v58 = vld [vmem:[%s3173_s2 + $0x178] sm:$0xff]  ;;  %v114_v61 = vld [vmem:[%s3173_s2 + $0x288] sm:$0xff]  ;;  %v145_v1 = vld [vmem:[%s3173_s2 + $0x380] sm:$0xff]  ;;  %v2609_v9 = vpack.c.bf16 %v48_v53, %v47_v52 }
  0x18   :  { %1947 = vmatprep.subr.bf16.mxu1 %v2508_v13  ;;  %v146_v2 = vld [vmem:[%s3173_s2 + $0x388] sm:$0xff]  ;;  %v2613_v10 = vpack.c.bf16 %v80_v58, %v79_v56  ;;  %v2615_v11 = vpack.c.bf16 %v114_v61, %v113_v60  ;;  %v97_v14 = vld [vmem:[%s3173_s2 + $0x200] sm:$0xff]  ;;  %v115_v24 = vld [vmem:[%s3173_s2 + $0x290] sm:$0xff]  ;;  %v2648_v36 = vrot.slane %v192_v63, %v2520_v19  ;;  %v207_v60 = vcombine.high %v2639_v30, %v2639_v30 }
  0x19   :  { %1917 = vmatpush3.bf16.msra.mxu0 %v2529_v23  ;;  %281 = vmatprep.mubr.f32.mxu0 %v190_v47  ;;  %v191_v62 = vcombine.high %v189_v48, %v189_v48  ;;  %v98_v15 = vld [vmem:[%s3173_s2 + $0x208] sm:$0xff]  ;;  %v129_v18 = vld [vmem:[%s3173_s2 + $0x300] sm:$0xff]  ;;  %v2627_v20 = vpack.c.bf16 %v146_v2, %v145_v1  ;;  %v116_v29 = vld [vmem:[%s3173_s2 + $0x298] sm:$0xff] }
  0x1a   :  { %1919 = vmatprep.subr.bf16.mxu0 %v2538_v28  ;;  %v130_v22 = vld [vmem:[%s3173_s2 + $0x308] sm:$0xff]  ;;  %v147_v31 = vld [vmem:[%s3173_s2 + $0x390] sm:$0xff]  ;;  %v148_v35 = vld [vmem:[%s3173_s2 + $0x398] sm:$0xff]  ;;  %v2651_v37 = vpack.c.bf16 %v98_v15, %v97_v14  ;;  %v2657_v42 = vpack.c.bf16 %v116_v29, %v115_v24  ;;  %v208_v63 = vcombine.high %v2648_v36, %v2648_v36 }
  0x1b   :  { %1949 = vmatpush3.bf16.msra.mxu1 %v2536_v27  ;;  %351 = vmatprep.mubr.f32.mxu1 %v191_v62  ;;  %v2655_v41 = vpack.c.bf16 %v130_v22, %v129_v18  ;;  %v99_v44 = vld [vmem:[%s3173_s2 + $0x210] sm:$0xff]  ;;  %v100_v46 = vld [vmem:[%s3173_s2 + $0x218] sm:$0xff]  ;;  %v2669_v52 = vpack.c.bf16 %v148_v35, %v147_v31  ;;  %v117_v56 = vld [vmem:[%s3173_s2 + $0x2a0] sm:$0xff] }
  0x1c   :  { %1951 = vmatprep.subr.bf16.mxu1 %v2550_v32  ;;  %v131_v47 = vld [vmem:[%s3173_s2 + $0x310] sm:$0xff]  ;;  %v132_v53 = vld [vmem:[%s3173_s2 + $0x318] sm:$0xff]  ;;  %v118_v58 = vld [vmem:[%s3173_s2 + $0x2a8] sm:$0xff]  ;;  %v2691_v1 = vpack.c.bf16 %v100_v46, %v99_v44 }
  0x1d   :  { %1921 = vmatpush3.bf16.msra.mxu0 %v2569_v45  ;;  %v149_v61 = vld [vmem:[%s3173_s2 + $0x3a0] sm:$0xff]  ;;  %v150_v62 = vld [vmem:[%s3173_s2 + $0x3a8] sm:$0xff]  ;;  %v2697_v2 = vpack.c.bf16 %v118_v58, %v117_v56  ;;  %v119_v24 = vld [vmem:[%s3173_s2 + $0x2b0] sm:$0xff] }
  0x1e   :  { %1923 = vmatprep.subr.bf16.mxu0 %v2579_v50  ;;  %v101_v14 = vld [vmem:[%s3173_s2 + $0x220] sm:$0xff]  ;;  %v102_v15 = vld [vmem:[%s3173_s2 + $0x228] sm:$0xff]  ;;  %v2709_v18 = vpack.c.bf16 %v150_v62, %v149_v61  ;;  %v120_v29 = vld [vmem:[%s3173_s2 + $0x2b8] sm:$0xff] }
  0x1f   :  { %1953 = vmatpush3.bf16.msra.mxu1 %v2577_v49  ;;  %v134_v22 = vld [vmem:[%s3173_s2 + $0x328] sm:$0xff]  ;;  %v151_v31 = vld [vmem:[%s3173_s2 + $0x3b0] sm:$0xff]  ;;  %v152_v35 = vld [vmem:[%s3173_s2 + $0x3b8] sm:$0xff]  ;;  %v2727_v44 = vpack.c.bf16 %v102_v15, %v101_v14 }
  0x20   :  { %1955 = vmatprep.subr.bf16.mxu1 %v2591_v57  ;;  %v104_v56 = vld [vmem:[%s3173_s2 + $0x238] sm:$0xff]  ;;  %v135_v58 = vld [vmem:[%s3173_s2 + $0x330] sm:$0xff]  ;;  %v121_v62 = vld [vmem:[%s3173_s2 + $0x2c0] sm:$0xff] }
  0x21   :  { %1925 = vmatpush3.bf16.msra.mxu0 %v2609_v9  ;;  %v136_v61 = vld [vmem:[%s3173_s2 + $0x338] sm:$0xff]  ;;  %v153_v14 = vld [vmem:[%s3173_s2 + $0x3c0] sm:$0xff]  ;;  %v154_v15 = vld [vmem:[%s3173_s2 + $0x3c8] sm:$0xff] }
  0x22   :  { %1959 = vmatprep.subr.bf16.mxu0 %v2615_v11 }
  0x23   :  { %1957 = vmatpush3.bf16.msra.mxu1 %v2613_v10 }
  0x24   :  { %1991 = vmatprep.subr.bf16.mxu1 %v2627_v20  ;;  %282 = vmatmul.mubr.f32.vlgmr.msra.gmra.mrb[0].mxu0 %v182_v40  ;;  %v2695_v40 = vpack.c.bf16 %v132_v53, %v131_v47  ;;  %v2733_v47 = vpack.c.bf16 %v120_v29, %v119_v24  ;;  %v103_v53 = vld [vmem:[%s3173_s2 + $0x230] sm:$0xff]  ;;  %v105_v29 = vld [vmem:[%s3173_s2 + $0x240] sm:$0xff] }
  0x25   :  { %1961 = vmatpush3.bf16.msra.mxu0 %v2651_v37  ;;  %421 = vmatprep.mubr.f32.mxu0 %v207_v60  ;;  %v2745_v60 = vpack.c.bf16 %v152_v35, %v151_v31  ;;  %v106_v31 = vld [vmem:[%s3173_s2 + $0x248] sm:$0xff]  ;;  %v137_v35 = vld [vmem:[%s3173_s2 + $0x340] sm:$0xff] }
  0x26   :  { %352 = vmatmul.mubr.f32.vlgmr.msra.gmra.mrb[0].mxu1 %v189_v48  ;;  %1963 = vmatprep.subr.bf16.mxu0 %v2657_v42  ;;  %v133_v48 = vld [vmem:[%s3173_s2 + $0x320] sm:$0xff]  ;;  %3211 = vst [vmem:[#allocation3_spill] sm:$0xff] %v2733_v47 }
  0x27   :  { %1993 = vmatpush3.bf16.msra.mxu1 %v2655_v41  ;;  %491 = vmatprep.mubr.f32.mxu1 %v208_v63  ;;  %v2731_v46 = vpack.c.bf16 %v134_v22, %v133_v48  ;;  %3212 = vst [vmem:[#allocation4_spill] sm:$0xff] %v2745_v60  ;;  %v122_v63 = vld [vmem:[%s3173_s2 + $0x2c8] sm:$0xff]  ;;  %v2763_v48 = vpack.c.bf16 %v104_v56, %v103_v53 }
  0x28   :  { %1995 = vmatprep.subr.bf16.mxu1 %v2669_v52  ;;  %v2767_v22 = vpack.c.bf16 %v136_v61, %v135_v58  ;;  %v2769_v24 = vpack.c.bf16 %v122_v63, %v121_v62  ;;  %v2781_v53 = vpack.c.bf16 %v154_v15, %v153_v14  ;;  %v138_v56 = vld [vmem:[%s3173_s2 + $0x348] sm:$0xff]  ;;  %v123_v58 = vld [vmem:[%s3173_s2 + $0x2d0] sm:$0xff]  ;;  %v124_v61 = vld [vmem:[%s3173_s2 + $0x2d8] sm:$0xff]  ;;  %v2799_v14 = vpack.c.bf16 %v106_v31, %v105_v29 }
  0x29   :  { %1965 = vmatpush3.bf16.msra.mxu0 %v2691_v1  ;;  %3210 = vst [vmem:[#allocation2_spill] sm:$0xff] %v2731_v46  ;;  %3213 = vst [vmem:[#allocation5_spill] sm:$0xff] %v2763_v48  ;;  %v155_v62 = vld [vmem:[%s3173_s2 + $0x3d0] sm:$0xff]  ;;  %v156_v63 = vld [vmem:[%s3173_s2 + $0x3d8] sm:$0xff]  ;;  %v2803_v15 = vpack.c.bf16 %v138_v56, %v137_v35 }
  0x2a   :  { %1967 = vmatprep.subr.bf16.mxu0 %v2697_v2  ;;  %3214 = vst [vmem:[#allocation6_spill] sm:$0xff] %v2767_v22  ;;  %3215 = vst [vmem:[#allocation7_spill] sm:$0xff] %v2769_v24  ;;  %v139_v29 = vld [vmem:[%s3173_s2 + $0x350] sm:$0xff]  ;;  %v2817_v31 = vpack.c.bf16 %v156_v63, %v155_v62  ;;  %v140_v35 = vld [vmem:[%s3173_s2 + $0x358] sm:$0xff] }
  0x2b   :  { %1997 = vmatpush3.bf16.msra.mxu1 %v2695_v40  ;;  %3216 = vst [vmem:[#allocation8_spill] sm:$0xff] %v2781_v53  ;;  %3217 = vst [vmem:[#allocation9_spill] sm:$0xff] %v2799_v14  ;;  %v125_v56 = vld [vmem:[%s3173_s2 + $0x2e0] sm:$0xff]  ;;  %v158_v62 = vld [vmem:[%s3173_s2 + $0x3e8] sm:$0xff] }
  0x2c   :  { %1999 = vmatprep.subr.bf16.mxu1 %v2709_v18  ;;  %3218 = vst [vmem:[#allocation10_spill] sm:$0xff] %v2803_v15  ;;  %3220 = vst [vmem:[#allocation12_spill] sm:$0xff] %v2817_v31 }
  0x2d   :  { %1969 = vmatpush3.bf16.msra.mxu0 %v2727_v44 }
  0x2e   :  { %1971 = vmatprep.subr.bf16.mxu0 %v2733_v47  ;;  %v107_v47 = vld [vmem:[%s3173_s2 + $0x250] sm:$0xff] }
  0x2f   :  { %2001 = vmatpush3.bf16.msra.mxu1 %v2731_v46  ;;  %v108_v46 = vld [vmem:[%s3173_s2 + $0x258] sm:$0xff] }
  0x30   :  { %2003 = vmatprep.subr.bf16.mxu1 %v2745_v60  ;;  %v2805_v60 = vpack.c.bf16 %v124_v61, %v123_v58  ;;  %v126_v58 = vld [vmem:[%s3173_s2 + $0x2e8] sm:$0xff]  ;;  %v157_v61 = vld [vmem:[%s3173_s2 + $0x3e0] sm:$0xff]  ;;  %v2835_v63 = vpack.c.bf16 %v108_v46, %v107_v47 }
  0x31   :  { %1973 = vmatpush3.bf16.msra.mxu0 %v2763_v48  ;;  %v110_v48 = vld [vmem:[%s3173_s2 + $0x268] sm:$0xff]  ;;  %v141_v46 = vld [vmem:[%s3173_s2 + $0x360] sm:$0xff]  ;;  %v2853_v47 = vpack.c.bf16 %v158_v62, %v157_v61  ;;  %v160_v61 = vld [vmem:[%s3173_s2 + $0x3f8] sm:$0xff] }
  0x32   :  { %1975 = vmatprep.subr.bf16.mxu0 %v2769_v24  ;;  %3219 = vst [vmem:[#allocation11_spill] sm:$0xff] %v2805_v60  ;;  %3221 = vst [vmem:[#allocation13_spill] sm:$0xff] %v2835_v63  ;;  %v2841_v24 = vpack.c.bf16 %v126_v58, %v125_v56  ;;  %v128_v56 = vld [vmem:[%s3173_s2 + $0x2f8] sm:$0xff]  ;;  %v159_v58 = vld [vmem:[%s3173_s2 + $0x3f0] sm:$0xff] }
  0x33   :  { %2005 = vmatpush3.bf16.msra.mxu1 %v2767_v22  ;;  %v109_v22 = vld [vmem:[%s3173_s2 + $0x260] sm:$0xff]  ;;  %3224 = vst [vmem:[#allocation16_spill] sm:$0xff] %v2853_v47 }
  0x34   :  { %2007 = vmatprep.subr.bf16.mxu1 %v2781_v53  ;;  %v2839_v53 = vpack.c.bf16 %v140_v35, %v139_v29  ;;  %3223 = vst [vmem:[#allocation15_spill] sm:$0xff] %v2841_v24  ;;  %v142_v29 = vld [vmem:[%s3173_s2 + $0x368] sm:$0xff]  ;;  %v127_v35 = vld [vmem:[%s3173_s2 + $0x2f0] sm:$0xff]  ;;  %v2871_v62 = vpack.c.bf16 %v110_v48, %v109_v22  ;;  %v2886_v48 = vpack.c.bf16 %v160_v61, %v159_v58  ;;  %v3194_v61 = vmov 0.0  }
  0x35   :  { %1977 = vmatpush3.bf16.msra.mxu0 %v2799_v14  ;;  %v112_v14 = vld [vmem:[%s3173_s2 + $0x278] sm:$0xff]  ;;  %v143_v22 = vld [vmem:[%s3173_s2 + $0x370] sm:$0xff] }
  0x36   :  { %1979 = vmatprep.subr.bf16.mxu0 %v2805_v60  ;;  %3222 = vst [vmem:[#allocation14_spill] sm:$0xff] %v2839_v53  ;;  %3225 = vst [vmem:[#allocation17_spill] sm:$0xff] %v2871_v62  ;;  %v2877_v60 = vpack.c.bf16 %v128_v56, %v127_v35  ;;  %v3198_v56 = vmov 0.0|0.0   ;;  %v163_v58 = vld [vmem:[%s3175_s3 + $0x10] sm:$0xff] }
  0x37   :  { %2009 = vmatpush3.bf16.msra.mxu1 %v2803_v15  ;;  %v111_v15 = vld [vmem:[%s3173_s2 + $0x270] sm:$0xff]  ;;  %3228 = vst [vmem:[#allocation20_spill] sm:$0xff] %v2886_v48 }
  0x38   :  { %2011 = vmatprep.subr.bf16.mxu1 %v2817_v31  ;;  %v2875_v31 = vpack.c.bf16 %v142_v29, %v141_v46  ;;  %3227 = vst [vmem:[#allocation19_spill] sm:$0xff] %v2877_v60  ;;  %v144_v46 = vld [vmem:[%s3173_s2 + $0x378] sm:$0xff]  ;;  %v2895_v29 = vpack.c.bf16 %v112_v14, %v111_v15  ;;  %v161_v14 = vld [vmem:[%s3175_s3] sm:$0xff]  ;;  %v162_v15 = vld [vmem:[%s3175_s3 + $0x8] sm:$0xff] }
  0x39   :  { %1981 = vmatpush3.bf16.msra.mxu0 %v2835_v63  ;;  %v2899_v35 = vpack.c.bf16 %v144_v46, %v143_v22  ;;  %v581_v46 = vld [vmem:[%s3176_s1] sm:$0x3]  ;;  %v3233_v63 = vmov 0.0  }
  0x3a   :  { %1983 = vmatprep.subr.bf16.mxu0 %v2841_v24  ;;  %3226 = vst [vmem:[#allocation18_spill] sm:$0xff] %v2875_v31  ;;  %3229 = vst [vmem:[#allocation21_spill] sm:$0xff] %v2895_v29  ;;  %583 = vrot.lane.b32.xlu0 %v581_v46, %s2251_s19 }
  0x3b   :  { %2013 = vmatpush3.bf16.msra.mxu1 %v2839_v53  ;;  %3230 = vst [vmem:[#allocation22_spill] sm:$0xff] %v2899_v35 }
  0x3c   :  { %2015 = vmatprep.subr.bf16.mxu1 %v2853_v47 }
  0x3d   :  { %1985 = vmatpush3.bf16.msra.mxu0 %v2871_v62 }
  0x3e   :  { %1987 = vmatprep.subr.bf16.mxu0 %v2877_v60 }
  0x3f   :  { %2017 = vmatpush3.bf16.msra.mxu1 %v2875_v31 }
  0x40   :  { %2019 = vmatprep.subr.bf16.mxu1 %v2886_v48 }
  0x41   :  { %1989 = vmatpush3.bf16.msra.mxu0 %v2895_v29 }
  0x42   :  { %2022 = vmatprep.subr.bf16.mxu0 %v3198_v56 }
  0x43   :  { %2021 = vmatpush3.bf16.msra.mxu1 %v2899_v35 }
  0x44   :  { %422 = vmatmul.mubr.f32.vlgmr.msra.gmra.mrb[2].mxu0 %v2639_v30  ;;  %v2918_v30 = vpack.c.bf16 %v162_v15, %v161_v14  ;;  %2028 = vmatprep.subr.bf16.mxu1 %v3198_v56  ;;  %v2937_v15 = vld [vmem:[%s3177_s6] ss:$0 sm:$0xff] }
  0x45   :  { %1873 = vmatprep.mubr.msk.f32.mxu0 %vm2249_vm0, %v3194_v61 }
  0x46   :  { %492 = vmatmul.mubr.f32.vlgmr.msra.gmra.mrb[2].mxu1 %v2648_v36  ;;  %3231 = vst [vmem:[#allocation23_spill] sm:$0xff] %v2918_v30  ;;  %v164_v36 = vld [vmem:[%s3175_s3 + $0x18] sm:$0xff]  ;;  %2024 = vmatpush3.bf16.msra.mxu0 %v2918_v30 }
  0x47   :  { %1880 = vmatprep.mubr.msk.f32.mxu1 %vm2249_vm0, %v3194_v61  ;;  %v2927_v22 = vpack.c.bf16 %v164_v36, %v163_v58  ;;  %2025 = vmatprep.subr.bf16.mxu0 %v3198_v56 }
  0x49   :  { %3232 = vst [vmem:[#allocation24_spill] sm:$0xff] %v2927_v22 }
  0x4a   :  { %2027 = vmatpush3.bf16.msra.mxu0 %v2927_v22 }
  0xf7   :  { %v1604_v14 = vpop.f32.mrb[0].mxu0 }
  0xf8   :  { %v1605_v61 = vpop.f32.mrb[1].mxu0 }
  0xf9   :  { %v1639_v30 = vpop.f32.mrb[0].mxu1  ;;  %v1606_v58 = vadd.f32 %v1605_v61, %v1604_v14  ;;  %v592_v61 = vld [vmem:[%s3178_s4] sm:$0xff] }
  0xfa   :  { %v1640_v36 = vpop.f32.mrb[1].mxu1 }
  0xfb   :  { %v1641_v35 = vadd.f32 %v1640_v36, %v1639_v30  ;;  %v284_v56 = vadd.f32 %v1606_v58, %v2937_v15  ;;  %v676_v58 = vld [vmem:[%s3180_s5 + $0x8] sm:$0xff] }
  0xfc   :  { %v684_v36 = vld [vmem:[%s3180_s5 + $0x48] sm:$0xff] }
  0xfd   :  { %v354_v22 = vadd.f32 %v1641_v35, %v284_v56  ;;  %v593_v35 = vld [vmem:[%s3178_s4 + $0x8] sm:$0xff]  ;;  %s2252_s4 = smov 112  }
 0x117   :  { %v1674_v29 = vpop.f32.mrb[2].mxu0 }
 0x118   :  { %v1675_v48 = vpop.f32.mrb[3].mxu0 }
 0x119   :  { %v1709_v60 = vpop.f32.mrb[2].mxu1  ;;  %v1676_v31 = vadd.f32 %v1675_v48, %v1674_v29  ;;  %v2029_v48 = vpack.c.bf16 %v593_v35, %v592_v61  ;;  %v584_v29 = vpop.permute.xlu0 %583  ;;  %v2031_v61 = vpack.c.bf16 %v684_v36, %v676_v58  ;;  %v686_v35 = vld [vmem:[%s3180_s5 + $0x58] sm:$0xff] }
 0x11a   :  { %v1710_v62 = vpop.f32.mrb[3].mxu1 }
 0x11b   :  { %v1711_v46 = vadd.f32 %v1710_v62, %v1709_v60  ;;  %v424_v47 = vadd.f32 %v1676_v31, %v354_v22  ;;  %2030 = vmatpush3.bf16.msra.mxu1 %v2029_v48  ;;  %v2951_v60 = vld [vmem:[%s3177_s6 + $0x1] ss:$0 sm:$0xff] }
 0x11c   :  { %v675_v48 = vld [vmem:[%s3180_s5] sm:$0xff]  ;;  %2032 = vmatprep.subr.bf16.mxu1 %v2031_v61 }
 0x11d   :  { %v494_v24 = vadd.f32 %v1711_v46, %v424_v47  ;;  %v678_v46 = vld [vmem:[%s3180_s5 + $0x18] sm:$0xff]  ;;  %v699_v61 = vld [vmem:[%s3180_s5 + $0xc0] sm:$0xff] }
 0x11f   :  { %2207 = vtanh.f32 %v494_v24 }
 0x129   :  { %v2208_v53 = vpop.eup %2207 }
 0x12a   :  { %1874 = vmatmul.mubr.msk.f32.vlgmr.msra.gmra.mrb[4].mxu0 %vm504_vm1, %v2208_v53 }
 0x12b   :  { %886 = vmatprep.mubr.f32.mxu0 %v3233_v63 }
 0x1fd   :  { %v574_v24 = vpop.f32.mrb[4].mxu0 }
 0x1fe   :  { %v575_v53 = vadd.f32 %v2951_v60, %v574_v24  ;;  %v1875_v31 = vpop.f32.mrb[5].mxu0  ;;  %v683_v24 = vld [vmem:[%s3180_s5 + $0x40] sm:$0xff] }
 0x1ff   :  { %v2033_v31 = vpack.c.bf16 %v683_v24, %v675_v48  ;;  %v701_v24 = vld [vmem:[%s3180_s5 + $0xd0] sm:$0xff] }
 0x200   :  { %v578_v47 = vmul.f32 0.5, %v575_v53  ;;  %1530 = vst.msk [vmem:[%s3179_s9] sm:$0x3] %vm1529_vm2, %v575_v53 }
 0x202   :  { %v579_v62 = vmul.f32 1.442695, %v578_v47  ;;  %v677_v47 = vld [vmem:[%s3180_s5 + $0x10] sm:$0xff] }
 0x204   :  { %2209 = vpow2.f32 %v579_v62  ;;  %v685_v62 = vld [vmem:[%s3180_s5 + $0x50] sm:$0xff] }
 0x20e   :  { %v2210_v56 = vpop.eup %2209 }
 0x20f   :  { %v586_v30 = vmul.f32 %v2210_v56, %v584_v29  ;;  %v692_v29 = vld [vmem:[%s3180_s5 + $0x88] sm:$0xff]  ;;  %v2041_v56 = vpack.c.bf16 %v685_v62, %v677_v47 }
 0x211   :  { %588 = vrot.lane.b32.xlu0 %v586_v30, %s2252_s4  ;;  %v700_v30 = vld [vmem:[%s3180_s5 + $0xc8] sm:$0xff] }
 0x212   :  { %v2035_v58 = vpack.c.bf16 %v700_v30, %v692_v29  ;;  %v682_v29 = vld [vmem:[%s3180_s5 + $0x38] sm:$0xff] }
 0x283   :  { %v589_v22 = vpop.permute.xlu0 %588 }
 0x284   :  { %v591_v14 = vadd.f32 %v589_v22, %v575_v53  ;;  %v2039_v53 = vpack.c.bf16 %v686_v35, %v678_v46  ;;  %v694_v22 = vld [vmem:[%s3180_s5 + $0x98] sm:$0xff]  ;;  %v691_v46 = vld [vmem:[%s3180_s5 + $0x80] sm:$0xff]  ;;  %v693_v35 = vld [vmem:[%s3180_s5 + $0x90] sm:$0xff] }
 0x285   :  { %v2037_v48 = vpack.c.bf16 %v699_v61, %v691_v46  ;;  %v2045_v47 = vpack.c.bf16 %v701_v24, %v693_v35  ;;  %v679_v61 = vld [vmem:[%s3180_s5 + $0x20] sm:$0xff]  ;;  %v689_v24 = vld [vmem:[%s3180_s5 + $0x70] sm:$0xff] }
 0x286   :  { %1531 = vrot.lane.b32.xlu1 %v591_v14, %s2253_s28  ;;  %1881 = vmatmul.mubr.msk.f32.vlgmr.msra.gmra.mrb[4].mxu1 %vm600_vm3, %v591_v14  ;;  %v702_v14 = vld [vmem:[%s3180_s5 + $0xd8] sm:$0xff]  ;;  %v687_v35 = vld [vmem:[%s3180_s5 + $0x60] sm:$0xff] }
 0x287   :  { %815 = vmatprep.mubr.f32.mxu1 %v3233_v63  ;;  %2040 = vmatprep.subr.bf16.mxu0 %v2039_v53  ;;  %v2043_v36 = vpack.c.bf16 %v702_v14, %v694_v22  ;;  %v680_v53 = vld [vmem:[%s3180_s5 + $0x28] sm:$0xff]  ;;  %v1557_v14 = vld [vmem:[%s3177_s6 + $0x2] ss:$0 sm:$0xff] }
 0x288   :  { %2034 = vmatpush1.bf16.msra.mxu1 %v2033_v31  ;;  %2042 = vmatpush1.bf16.msra.mxu0 %v2041_v56  ;;  %v688_v31 = vld [vmem:[%s3180_s5 + $0x68] sm:$0xff]  ;;  %v690_v56 = vld [vmem:[%s3180_s5 + $0x78] sm:$0xff] }
 0x289   :  { %2036 = vmatprep.subr.bf16.mxu1 %v2035_v58  ;;  %2044 = vmatprep.subr.bf16.mxu0 %v2043_v36  ;;  %v2047_v62 = vpack.c.bf16 %v688_v31, %v680_v53  ;;  %v2055_v30 = vpack.c.bf16 %v690_v56, %v682_v29  ;;  %v696_v53 = vld [vmem:[%s3180_s5 + $0xa8] sm:$0xff]  ;;  %v2049_v29 = vpack.c.bf16 %v687_v35, %v679_v61 }
 0x28a   :  { %v704_v31 = vld [vmem:[%s3180_s5 + $0xe8] sm:$0xff] }
 0x28c   :  { %2038 = vmatpush1.bf16.msra.mxu1 %v2037_v48  ;;  %2046 = vmatpush1.bf16.msra.mxu0 %v2045_v47  ;;  %v681_v48 = vld [vmem:[%s3180_s5 + $0x30] sm:$0xff]  ;;  %v698_v47 = vld [vmem:[%s3180_s5 + $0xb8] sm:$0xff] }
 0x28d   :  { %2048 = vmatprep.subr.bf16.mxu1 %v2047_v62  ;;  %2056 = vmatprep.subr.bf16.mxu0 %v2055_v30  ;;  %v706_v62 = vld [vmem:[%s3180_s5 + $0xf8] sm:$0xff]  ;;  %v2057_v56 = vpack.c.bf16 %v689_v24, %v681_v48  ;;  %v695_v30 = vld [vmem:[%s3180_s5 + $0xa0] sm:$0xff] }
 0x2f8   :  { %v1532_v22 = vpop.permute.xlu1 %1531 }
 0x2f9   :  { %1535 = vst.msk [vmem:[%s3179_s9] sm:$0x3] %vm1534_vm4, %v1532_v22  ;;  %v2051_v22 = vpack.c.bf16 %v704_v31, %v696_v53 }
 0x359   :  { %v670_v58 = vpop.f32.mrb[4].mxu1 }
 0x35a   :  { %v671_v36 = vadd.f32 %v1557_v14, %v670_v58  ;;  %v1882_v46 = vpop.f32.mrb[5].mxu1  ;;  %v2059_v14 = vpack.c.bf16 %v706_v62, %v698_v47  ;;  %v703_v58 = vld [vmem:[%s3180_s5 + $0xe0] sm:$0xff] }
 0x35b   :  { %v705_v46 = vld [vmem:[%s3180_s5 + $0xf0] sm:$0xff]  ;;  %v2053_v35 = vpack.c.bf16 %v703_v58, %v695_v30 }
 0x35c   :  { %2211 = vtanh.f32 %v671_v36  ;;  %v697_v36 = vld [vmem:[%s3180_s5 + $0xb0] sm:$0xff] }
 0x35d   :  { %v2061_v48 = vpack.c.bf16 %v705_v46, %v697_v36 }
 0x366   :  { %v2212_v61 = vpop.eup %2211 }
 0x367   :  { %1559 = vmatmul.mubr.msk.f32.vlgmr.msra.gmra.mrb[6].mxu1 %vm504_vm1, %v2212_v61  ;;  %1560 = vmatmul.mubr.msk.f32.vlgmr.msra.gmra.mrb[6].mxu0 %vm504_vm1, %v2212_v61 }
 0x368   :  { %2050 = vmatpush1.bf16.msra.mxu1 %v2049_v29  ;;  %2058 = vmatpush1.bf16.msra.mxu0 %v2057_v56 }
 0x369   :  { %2052 = vmatprep.subr.bf16.mxu1 %v2051_v22  ;;  %2060 = vmatprep.subr.bf16.mxu0 %v2059_v14 }
 0x36a   :  { %957 = vmatprep.mubr.f32.mxu1 %v3233_v63  ;;  %1028 = vmatprep.mubr.f32.mxu0 %v3233_v63 }
 0x36c   :  { %2054 = vmatpush1.bf16.msra.mxu1 %v2053_v35  ;;  %2062 = vmatpush1.bf16.msra.mxu0 %v2061_v48 }
 0x36d   :  { %2064 = vmatprep.subr.bf16.mxu1 %v2314_v3  ;;  %2096 = vmatprep.subr.bf16.mxu0 %v2327_v8  ;;  %v710_v3 = vsub.s32 0, %v2481_v0  ;;  %v32_v8 = vld [vmem:[%s3177_s6 + $0x3] sm:$0xff] }
 0x36f   :  { %1561 = vmatmul.mubr.msk.f32.vlgmr.msra.gmra.mrb[8].mxu1 %vm504_vm1, %v2212_v61  ;;  %1562 = vmatmul.mubr.msk.f32.vlgmr.msra.gmra.mrb[8].mxu0 %vm504_vm1, %v2212_v61 }
 0x370   :  { %2066 = vmatpush3.bf16.msra.mxu1 %v2325_v7  ;;  %2098 = vmatpush3.bf16.msra.mxu0 %v2339_v12  ;;  %v718_v7 = vsub.s32 2, %v2481_v0  ;;  %v714_v12 = vsub.s32 1, %v2481_v0 }
 0x371   :  { %2068 = vmatprep.subr.bf16.mxu1 %v2352_v16  ;;  %2100 = vmatprep.subr.bf16.mxu0 %v2366_v21  ;;  %v722_v16 = vsub.s32 3, %v2481_v0 }
 0x372   :  { %v719_v21 = vrot.slane %v32_v8, %v718_v7 }
 0x374   :  { %2070 = vmatpush3.bf16.msra.mxu1 %v2354_v17  ;;  %2102 = vmatpush3.bf16.msra.mxu0 %v2378_v25  ;;  %v711_v17 = vrot.slane %v32_v8, %v710_v3  ;;  %v715_v25 = vrot.slane %v32_v8, %v714_v12 }
 0x375   :  { %2072 = vmatprep.subr.bf16.mxu1 %v2380_v26  ;;  %2104 = vmatprep.subr.bf16.mxu0 %v2404_v34  ;;  %v723_v26 = vrot.slane %v32_v8, %v722_v16 }
 0x378   :  { %2074 = vmatpush3.bf16.msra.mxu1 %v2402_v33  ;;  %2106 = vmatpush3.bf16.msra.mxu0 %v2417_v38  ;;  %v726_v38 = vsub.s32 4, %v2481_v0 }
 0x379   :  { %2076 = vmatprep.subr.bf16.mxu1 %v2419_v39  ;;  %2108 = vmatprep.subr.bf16.mxu0 %v2431_v43 }
 0x37c   :  { %2078 = vmatpush3.bf16.msra.mxu1 %v2446_v51  ;;  %2110 = vmatpush3.bf16.msra.mxu0 %v2456_v54 }
 0x37d   :  { %2080 = vmatprep.subr.bf16.mxu1 %v2458_v55  ;;  %2112 = vmatprep.subr.bf16.mxu0 %v2470_v59  ;;  %v734_v55 = vsub.s32 6, %v2481_v0  ;;  %v730_v59 = vsub.s32 5, %v2481_v0 }
 0x380   :  { %2082 = vmatpush3.bf16.msra.mxu1 %v2490_v4  ;;  %2114 = vmatpush3.bf16.msra.mxu0 %v2494_v5 }
 0x381   :  { %2084 = vmatprep.subr.bf16.mxu1 %v2496_v6  ;;  %2116 = vmatprep.subr.bf16.mxu0 %v2508_v13  ;;  %v738_v6 = vsub.s32 7, %v2481_v0 }
 0x384   :  { %2086 = vmatpush3.bf16.msra.mxu1 %v2529_v23  ;;  %2118 = vmatpush3.bf16.msra.mxu0 %v2536_v27 }
 0x385   :  { %2088 = vmatprep.subr.bf16.mxu1 %v2538_v28  ;;  %2120 = vmatprep.subr.bf16.mxu0 %v2550_v32 }
 0x388   :  { %2090 = vmatpush3.bf16.msra.mxu1 %v2569_v45  ;;  %2122 = vmatpush3.bf16.msra.mxu0 %v2577_v49  ;;  %v727_v49 = vrot.slane %v32_v8, %v726_v38 }
 0x389   :  { %2092 = vmatprep.subr.bf16.mxu1 %v2579_v50  ;;  %2124 = vmatprep.subr.bf16.mxu0 %v2591_v57  ;;  %v735_v50 = vrot.slane %v32_v8, %v734_v55  ;;  %v731_v57 = vrot.slane %v32_v8, %v730_v59 }
 0x38c   :  { %2094 = vmatpush3.bf16.msra.mxu1 %v2609_v9  ;;  %2126 = vmatpush3.bf16.msra.mxu0 %v2613_v10 }
 0x38d   :  { %2128 = vmatprep.subr.bf16.mxu1 %v2615_v11  ;;  %2160 = vmatprep.subr.bf16.mxu0 %v2627_v20  ;;  %v739_v11 = vrot.slane %v32_v8, %v738_v6 }
 0x43a   :  { %v817_v33 = vpop.f32.mrb[6].mxu1  ;;  %v888_v34 = vpop.f32.mrb[6].mxu0 }
 0x43b   :  { %v818_v39 = vadd.f32 %v817_v33, %v711_v17  ;;  %v889_v43 = vadd.f32 %v888_v34, %v719_v21  ;;  %v819_v51 = vpop.f32.mrb[7].mxu1  ;;  %v890_v54 = vpop.f32.mrb[7].mxu0 }
 0x43c   :  { %v820_v4 = vadd.f32 %v819_v51, %v715_v25  ;;  %v891_v5 = vadd.f32 %v890_v54, %v723_v26 }
 0x43d   :  { %v1563_v13 = vmul.f32 -1.442695, %v818_v39  ;;  %v1565_v23 = vmul.f32 -1.442695, %v889_v43 }
 0x43e   :  { %v1564_v27 = vmul.f32 -1.442695, %v820_v4  ;;  %v1445_v28 = vcombine.low %v818_v39, %v820_v4  ;;  %v1566_v32 = vmul.f32 -1.442695, %v891_v5  ;;  %v1446_v45 = vcombine.low %v889_v43, %v891_v5 }
 0x43f   :  { %2213 = vpow2.f32 %v1563_v13 }
 0x440   :  { %2215 = vpow2.f32 %v1565_v23  ;;  %v1453_v9 = vrot.slane %v1445_v28, %v2520_v19  ;;  %v1460_v10 = vrot.slane %v1446_v45, %v2520_v19 }
 0x441   :  { %2217 = vpow2.f32 %v1564_v27 }
 0x442   :  { %2219 = vpow2.f32 %v1566_v32  ;;  %v1461_v20 = vcombine.low %v1453_v9, %v1460_v10  ;;  %v959_v0 = vpop.f32.mrb[8].mxu1  ;;  %v1030_v24 = vpop.f32.mrb[8].mxu0  ;;  %v3237_v9 = vld [vmem:[#allocation5_spill] sm:$0xff]  ;;  %v3239_v10 = vld [vmem:[#allocation7_spill] sm:$0xff] }
 0x443   :  { %v960_v53 = vadd.f32 %v959_v0, %v727_v49  ;;  %v1031_v31 = vadd.f32 %v1030_v24, %v735_v50  ;;  %v961_v47 = vpop.f32.mrb[9].mxu1  ;;  %v1032_v62 = vpop.f32.mrb[9].mxu0  ;;  %v3234_v50 = vld [vmem:[#allocation2_spill] sm:$0xff]  ;;  %v3244_v0 = vld [vmem:[#allocation12_spill] sm:$0xff]  ;;  %v3245_v24 = vld [vmem:[#allocation13_spill] sm:$0xff] }
 0x444   :  { %1481 = vst [vmem:[%s3181_s7] sm:$0xff] %v1461_v20  ;;  %v962_v29 = vadd.f32 %v961_v47, %v731_v57  ;;  %v1033_v56 = vadd.f32 %v1032_v62, %v739_v11  ;;  %v3235_v57 = vld [vmem:[#allocation3_spill] sm:$0xff]  ;;  %v3242_v11 = vld [vmem:[#allocation10_spill] sm:$0xff]  ;;  %v3248_v47 = vld [vmem:[#allocation16_spill] sm:$0xff] }
 0x445   :  { %v1567_v30 = vmul.f32 -1.442695, %v960_v53  ;;  %v1569_v22 = vmul.f32 -1.442695, %v1031_v31  ;;  %v3243_v20 = vld [vmem:[#allocation11_spill] sm:$0xff]  ;;  %v3249_v62 = vld [vmem:[#allocation17_spill] sm:$0xff] }
 0x446   :  { %v1568_v14 = vmul.f32 -1.442695, %v962_v29  ;;  %v1462_v58 = vcombine.low %v960_v53, %v962_v29  ;;  %v1570_v36 = vmul.f32 -1.442695, %v1033_v56  ;;  %v1463_v46 = vcombine.low %v1031_v31, %v1033_v56  ;;  %v3246_v53 = vld [vmem:[#allocation14_spill] sm:$0xff]  ;;  %v3247_v31 = vld [vmem:[#allocation15_spill] sm:$0xff] }
 0x447   :  { %2221 = vpow2.f32 %v1567_v30  ;;  %v3250_v29 = vld [vmem:[#allocation18_spill] sm:$0xff]  ;;  %v3251_v56 = vld [vmem:[#allocation19_spill] sm:$0xff]  ;;  %v3252_v30 = vld [vmem:[#allocation20_spill] sm:$0xff] }
 0x448   :  { %2223 = vpow2.f32 %v1569_v22  ;;  %v1470_v61 = vrot.slane %v1462_v58, %v2520_v19  ;;  %v1477_v35 = vrot.slane %v1463_v46, %v2520_v19  ;;  %v3253_v22 = vld [vmem:[#allocation21_spill] sm:$0xff]  ;;  %v3255_v58 = vmov 0.0|0.0   ;;  %v3257_v46 = vld [vmem:[#allocation24_spill] sm:$0xff] }
 0x449   :  { %v2214_v48 = vpop.eup %2213  ;;  %2225 = vpow2.f32 %v1568_v14  ;;  %v3254_v14 = vld [vmem:[#allocation22_spill] sm:$0xff] }
 0x44a   :  { %v2216_v3 = vpop.eup %2215  ;;  %v1059_v7 = vadd.f32 1.0, %v2214_v48  ;;  %2227 = vpow2.f32 %v1570_v36  ;;  %v1478_v8 = vcombine.low %v1470_v61, %v1477_v35  ;;  %v3256_v36 = vld [vmem:[#allocation23_spill] sm:$0xff] }
 0x44b   :  { %v2218_v12 = vpop.eup %2217  ;;  %v1061_v16 = vadd.f32 1.0, %v2216_v3 }
 0x44c   :  { %v2220_v17 = vpop.eup %2219  ;;  %2229 = vrcp.f32 %v1059_v7  ;;  %v1060_v21 = vadd.f32 1.0, %v2218_v12  ;;  %1482 = vst [vmem:[%s3181_s7 + $0x8] sm:$0xff] %v1478_v8 }
 0x44d   :  { %2231 = vrcp.f32 %v1061_v16  ;;  %v1062_v25 = vadd.f32 1.0, %v2220_v17 }
 0x44e   :  { %2233 = vrcp.f32 %v1060_v21 }
 0x44f   :  { %2235 = vrcp.f32 %v1062_v25 }
 0x451   :  { %v2222_v26 = vpop.eup %2221 }
 0x452   :  { %v2224_v33 = vpop.eup %2223  ;;  %v1063_v34 = vadd.f32 1.0, %v2222_v26 }
 0x453   :  { %v2226_v38 = vpop.eup %2225  ;;  %v1065_v39 = vadd.f32 1.0, %v2224_v33 }
 0x454   :  { %v2228_v43 = vpop.eup %2227  ;;  %2237 = vrcp.f32 %v1063_v34  ;;  %v1064_v51 = vadd.f32 1.0, %v2226_v38 }
 0x455   :  { %2239 = vrcp.f32 %v1065_v39  ;;  %v1066_v54 = vadd.f32 1.0, %v2228_v43 }
 0x456   :  { %v2230_v55 = vpop.eup %2229  ;;  %2241 = vrcp.f32 %v1064_v51 }
 0x457   :  { %v2232_v59 = vpop.eup %2231  ;;  %2243 = vrcp.f32 %v1066_v54 }
 0x458   :  { %v2234_v4 = vpop.eup %2233 }
 0x459   :  { %v2236_v5 = vpop.eup %2235  ;;  %v1491_v6 = vcombine.low %v2230_v55, %v2234_v4  ;;  %1147 = vmatprep.mubr.f32.mxu1 %v2234_v4 }
 0x45a   :  { %v1492_v13 = vcombine.low %v2232_v59, %v2236_v5  ;;  %1217 = vmatprep.mubr.f32.mxu0 %v2236_v5  ;;  %1148 = vmatmul.mubr.f32.vlgmr.msra.gmra.mrb[10].mxu1 %v2230_v55 }
 0x45b   :  { %v1499_v23 = vrot.slane %v1491_v6, %v2520_v19  ;;  %1218 = vmatmul.mubr.f32.vlgmr.msra.gmra.mrb[10].mxu0 %v2232_v59  ;;  %2130 = vmatpush3.bf16.msra.mxu1 %v2651_v37 }
 0x45c   :  { %v1506_v27 = vrot.slane %v1492_v13, %v2520_v19  ;;  %2162 = vmatpush3.bf16.msra.mxu0 %v2655_v41  ;;  %2132 = vmatprep.subr.bf16.mxu1 %v2657_v42 }
 0x45d   :  { %2164 = vmatprep.subr.bf16.mxu0 %v2669_v52 }
 0x45e   :  { %v2238_v28 = vpop.eup %2237  ;;  %v1507_v32 = vcombine.low %v1499_v23, %v1506_v27 }
 0x45f   :  { %v2240_v45 = vpop.eup %2239  ;;  %2134 = vmatpush3.bf16.msra.mxu1 %v2691_v1 }
 0x460   :  { %v2242_v49 = vpop.eup %2241  ;;  %1527 = vst [vmem:[%s3182_s8] sm:$0xff] %v1507_v32  ;;  %2166 = vmatpush3.bf16.msra.mxu0 %v2695_v40  ;;  %2136 = vmatprep.subr.bf16.mxu1 %v2697_v2  ;;  %v3236_v40 = vld [vmem:[#allocation4_spill] sm:$0xff] }
 0x461   :  { %v2244_v37 = vpop.eup %2243  ;;  %v1508_v41 = vcombine.low %v2238_v28, %v2242_v49  ;;  %1287 = vmatprep.mubr.f32.mxu1 %v2242_v49  ;;  %2168 = vmatprep.subr.bf16.mxu0 %v2709_v18  ;;  %v3238_v18 = vld [vmem:[#allocation6_spill] sm:$0xff] }
 0x462   :  { %v1509_v42 = vcombine.low %v2240_v45, %v2244_v37  ;;  %1357 = vmatprep.mubr.f32.mxu0 %v2244_v37 }
 0x463   :  { %v1516_v52 = vrot.slane %v1508_v41, %v2520_v19  ;;  %2138 = vmatpush3.bf16.msra.mxu1 %v2727_v44  ;;  %v3240_v44 = vld [vmem:[#allocation8_spill] sm:$0xff] }
 0x464   :  { %v1523_v1 = vrot.slane %v1509_v42, %v2520_v19  ;;  %2170 = vmatpush3.bf16.msra.mxu0 %v3234_v50  ;;  %2140 = vmatprep.subr.bf16.mxu1 %v3235_v57  ;;  %v3241_v19 = vld [vmem:[#allocation9_spill] sm:$0xff] }
 0x465   :  { %2172 = vmatprep.subr.bf16.mxu0 %v3236_v40 }
 0x466   :  { %v1524_v2 = vcombine.low %v1516_v52, %v1523_v1 }
 0x467   :  { %2142 = vmatpush3.bf16.msra.mxu1 %v3237_v9 }
 0x468   :  { %1528 = vst [vmem:[%s3182_s8 + $0x8] sm:$0xff] %v1524_v2  ;;  %2174 = vmatpush3.bf16.msra.mxu0 %v3238_v18  ;;  %2144 = vmatprep.subr.bf16.mxu1 %v3239_v10  ;;  %s2254_s8 = smov 48  }
 0x469   :  { %2176 = vmatprep.subr.bf16.mxu0 %v3240_v44 }
 0x46b   :  { %2146 = vmatpush3.bf16.msra.mxu1 %v3241_v19 }
 0x46c   :  { %2178 = vmatpush3.bf16.msra.mxu0 %v3242_v11  ;;  %2148 = vmatprep.subr.bf16.mxu1 %v3243_v20 }
 0x46d   :  { %2180 = vmatprep.subr.bf16.mxu0 %v3244_v0 }
 0x46f   :  { %2150 = vmatpush3.bf16.msra.mxu1 %v3245_v24 }
 0x470   :  { %2182 = vmatpush3.bf16.msra.mxu0 %v3246_v53  ;;  %2152 = vmatprep.subr.bf16.mxu1 %v3247_v31 }
 0x471   :  { %2184 = vmatprep.subr.bf16.mxu0 %v3248_v47 }
 0x473   :  { %2154 = vmatpush3.bf16.msra.mxu1 %v3249_v62 }
 0x474   :  { %2186 = vmatpush3.bf16.msra.mxu0 %v3250_v29  ;;  %2156 = vmatprep.subr.bf16.mxu1 %v3251_v56 }
 0x475   :  { %2188 = vmatprep.subr.bf16.mxu0 %v3252_v30 }
 0x477   :  { %2158 = vmatpush3.bf16.msra.mxu1 %v3253_v22 }
 0x478   :  { %2190 = vmatpush3.bf16.msra.mxu0 %v3254_v14  ;;  %2191 = vmatprep.subr.bf16.mxu1 %v3255_v58 }
 0x47a   :  { %1288 = vmatmul.mubr.f32.vlgmr.msra.gmra.mrb[12].mxu1 %v2238_v28 }
 0x47b   :  { %1358 = vmatmul.mubr.f32.vlgmr.msra.gmra.mrb[12].mxu0 %v2240_v45  ;;  %2193 = vmatpush3.bf16.msra.mxu1 %v3256_v36 }
 0x47c   :  { %2194 = vmatprep.subr.bf16.mxu1 %v3255_v58  ;;  %1891 = vmatprep.mubr.msk.f32.mxu1 %vm2249_vm0, %v3233_v63 }
 0x47f   :  { %2196 = vmatpush3.bf16.msra.mxu1 %v3257_v46 }
 0x52d   :  { %v1752_v61 = vpop.f32.mrb[10].mxu1 }
 0x52e   :  { %v1787_v35 = vpop.f32.mrb[10].mxu0  ;;  %v1753_v48 = vpop.f32.mrb[11].mxu1 }
 0x52f   :  { %v1754_v3 = vadd.f32 %v1753_v48, %v1752_v61  ;;  %v1788_v7 = vpop.f32.mrb[11].mxu0 }
 0x530   :  { %v1789_v8 = vadd.f32 %v1788_v7, %v1787_v35 }
 0x531   :  { %v1150_v12 = vadd.f32 %v1754_v3, %v2937_v15 }
 0x533   :  { %v1220_v16 = vadd.f32 %v1789_v8, %v1150_v12 }
 0x54d   :  { %v1822_v17 = vpop.f32.mrb[12].mxu1 }
 0x54e   :  { %v1857_v21 = vpop.f32.mrb[12].mxu0  ;;  %v1823_v25 = vpop.f32.mrb[13].mxu1 }
 0x54f   :  { %v1824_v26 = vadd.f32 %v1823_v25, %v1822_v17  ;;  %v1858_v33 = vpop.f32.mrb[13].mxu0 }
 0x550   :  { %v1859_v34 = vadd.f32 %v1858_v33, %v1857_v21 }
 0x551   :  { %v1290_v38 = vadd.f32 %v1824_v26, %v1220_v16 }
 0x553   :  { %v1360_v39 = vadd.f32 %v1859_v34, %v1290_v38 }
 0x555   :  { %2245 = vtanh.f32 %v1360_v39 }
 0x55f   :  { %v2246_v63 = vpop.eup %2245 }
 0x560   :  { %1892 = vmatmul.mubr.msk.f32.vlgmr.msra.gmra.mrb[14].mxu1 %vm504_vm1, %v2246_v63 }
 0x633   :  { %v1433_v43 = vpop.f32.mrb[14].mxu1 }
 0x634   :  { %v1434_v51 = vadd.f32 %v2951_v60, %v1433_v43  ;;  %v1893_v54 = vpop.f32.mrb[15].mxu1 }
 0x636   :  { %1537 = vrot.lane.b32.xlu1 %v1434_v51, %s2254_s8 }
 0x6a8   :  { %v1538_v15 = vpop.permute.xlu1 %1537 }
 0x6a9   :  { %1541 = vst.msk [vmem:[%s3179_s9] sm:$0x3] %vm1540_vm5, %v1538_v15 }

</bundles_post_ra>
